<compile_context>
chip_gen: v6e
topology: v6e:2x2x1
jax: 0.10.0
libtpu: 0.0.40
codegen_flags: <defaults>
</compile_context>

<pallas_src>
import functools
import math

import jax
import jax.numpy as jnp
from jax.experimental import pallas as pl
from jax.experimental.pallas import tpu as pltpu


# --------------------------------------------------------------------------
# small helpers
# --------------------------------------------------------------------------
def _largest_divisor_tile(n, max_tile, quantum):
    """Largest divisor of n that is a multiple of `quantum` and <= max_tile;
    falls back to n (full extent) when no such divisor exists."""
    if n <= max_tile:
        return n
    t = (max_tile // quantum) * quantum
    while t >= quantum:
        if n % t == 0:
            return t
        t -= quantum
    return n


def _pick_row_tile(m, block_rows):
    """Row-tile size: multiple of 8 (f32 sublane rule), prefers >=2 row tiles so
    v7x's two TensorCores both get work, prefers exact divisors of m."""
    if m <= 8:
        return m
    cap = min(block_rows, m)
    if cap == m and m >= 16:
        cap = max(8, (m // 2 // 8) * 8)     # force at least 2 parallel row tiles
    t = (cap // 8) * 8
    while t >= 8:
        if m % t == 0:
            return t
        t -= 8
    return max(8, (cap // 8) * 8)           # non-divisor fallback (masked tail)


def _vmem_limit_bytes(entries, *, floor=32 << 20, ceil=64 << 20):
    """Scoped-VMEM budget from the actual tile set: sum of (shape, dtype, bufs)
    with 2x margin, floored at the default scoped limit and capped at v7x's
    64 MiB physical VMEM (per TensorCore)."""
    need = 0
    for shape, dtype, bufs in entries:
        need += math.prod(shape) * jnp.dtype(dtype).itemsize * bufs
    return int(min(max(2 * need + (4 << 20), floor), ceil))


def _probe_copy_kernel(x_ref, o_ref):
    o_ref[...] = x_ref[...]


@functools.cache
def _single_buffer_ok():
    """Probe whether pipeline_mode=pl.Buffered(1) lowers on this jax/libtpu.
    Grid-invariant operands are single-buffered only when it does."""
    try:
        fn = pl.pallas_call(
            _probe_copy_kernel,
            out_shape=jax.ShapeDtypeStruct((16, 128), jnp.float32),
            grid=(2,),
            in_specs=[pl.BlockSpec((8, 128), lambda i: (0, 0),
                                   pipeline_mode=pl.Buffered(1))],
            out_specs=pl.BlockSpec((8, 128), lambda i: (i, 0)),
        )
        jax.block_until_ready(fn(jnp.ones((8, 128), jnp.float32)))
        return True
    except Exception:          # noqa: BLE001 - fall back to default buffering
        return False


def _inv_spec(shape, index_map):
    """BlockSpec for a grid-invariant operand: single-buffered when supported
    (halves its VMEM footprint; it is DMA'd once and stays resident)."""
    if _single_buffer_ok():
        return pl.BlockSpec(shape, index_map, pipeline_mode=pl.Buffered(1))
    return pl.BlockSpec(shape, index_map)


# --------------------------------------------------------------------------
# Fused kernel 1a: layernorm -> FFN -> residual, weights resident in VMEM
#   grid = (row tiles,) [parallel].  Used when w1/w2 fit the weight budget:
#   they are DMA'd from HBM exactly once (constant index_map, single buffer)
#   instead of once per row tile.
# --------------------------------------------------------------------------
def _ln_ffn_resident_kernel(x_ref, g_ref, bt_ref, w1_ref, b1_ref, w2_ref,
                            b2_ref, o_ref, *, eps):
    x = x_ref[...].astype(jnp.float32)
    n = x.shape[-1]
    mean = jnp.mean(x, axis=-1, keepdims=True)
    var = jnp.sum((x - mean) ** 2, axis=-1, keepdims=True) / (n - 1)   # unbiased
    inv = pl.reciprocal(jnp.sqrt(var) + eps, approx=False)             # EUP, not VALU divide
    ln = (g_ref[...].astype(jnp.float32) * (x - mean) * inv
          + bt_ref[...].astype(jnp.float32))
    # weight-dtype (bf16) activations into the MXU, f32 accumulation.
    h = (jnp.dot(ln.astype(w1_ref.dtype), w1_ref[...],
                 preferred_element_type=jnp.float32)
         + b1_ref[...].astype(jnp.float32))
    h = jnp.maximum(h, 0.0)
    y = (jnp.dot(h.astype(w2_ref.dtype), w2_ref[...],
                 preferred_element_type=jnp.float32)
         + b2_ref[...].astype(jnp.float32))
    o_ref[...] = (x + y).astype(o_ref.dtype)


# --------------------------------------------------------------------------
# Fused kernel 1b: layernorm -> FFN -> residual, reduction over d_ff chunks
#   grid = (row tiles [parallel], d_ff chunks [arbitrary/reduction]).
#   The f32 accumulator is seeded with the residual x; the LN cache is stored
#   in the weight dtype so the per-chunk matmul needs no cast.
# --------------------------------------------------------------------------
def _ln_ffn_reduce_kernel(x_ref, g_ref, bt_ref, w1_ref, b1_ref, w2_ref, b2_ref,
                          o_ref, ln_ref, acc_ref, *, eps):
    j = pl.program_id(1)

    @pl.when(j == 0)
    def _():
        x = x_ref[...].astype(jnp.float32)
        n = x.shape[-1]
        mean = jnp.mean(x, axis=-1, keepdims=True)
        var = jnp.sum((x - mean) ** 2, axis=-1, keepdims=True) / (n - 1)
        inv = pl.reciprocal(jnp.sqrt(var) + eps, approx=False)
        ln = (g_ref[...].astype(jnp.float32) * (x - mean) * inv
              + bt_ref[...].astype(jnp.float32))
        ln_ref[...] = ln.astype(ln_ref.dtype)        # cached in weight dtype
        acc_ref[...] = x                             # residual seeds accumulator

    h = (jnp.dot(ln_ref[...], w1_ref[...], preferred_element_type=jnp.float32)
         + b1_ref[...].astype(jnp.float32))
    h = jnp.maximum(h, 0.0)
    acc_ref[...] += jnp.dot(h.astype(w2_ref.dtype), w2_ref[...],
                            preferred_element_type=jnp.float32)

    @pl.when(j == pl.num_programs(1) - 1)
    def _():
        o_ref[...] = (acc_ref[...] + b2_ref[...].astype(jnp.float32)).astype(o_ref.dtype)


def fused_ln_ffn_residual(x, gamma, beta, w1, b1, w2, b2, *, eps=1e-6,
                          block_rows=256, block_ff=512,
                          weight_resident_budget=24 << 20):
    """out = x + relu(LN(x) @ w1 + b1) @ w2 + b2, in a single pallas_call."""
    B, S, E = x.shape
    Dff = w1.shape[1]
    M = B * S
    x2d = x.reshape(M, E)
    wdt = w1.dtype
    wb = 1 if _single_buffer_ok() else 2
    wbytes = 2 * E * Dff * jnp.dtype(wdt).itemsize

    tm = _pick_row_tile(M, block_rows)
    n_rows = pl.cdiv(M, tm)

    args = (x2d, gamma.reshape(1, E), beta.reshape(1, E),
            w1, b1.reshape(1, Dff), w2, b2.reshape(1, E))

    if wbytes <= weight_resident_budget:
        # ---- weights-resident, rows-only grid --------------------------------
        vmem = _vmem_limit_bytes([
            ((tm, E), x.dtype, 2), ((tm, E), x.dtype, 2),          # x tile, out tile
            ((E, Dff), wdt, wb), ((Dff, E), wdt, wb),              # w1, w2
            ((1, Dff), jnp.float32, 1), ((1, E), jnp.float32, 3),  # biases / gamma / beta
            ((tm, Dff), jnp.float32, 1), ((tm, E), jnp.float32, 2),  # live intermediates
        ])
        out = pl.pallas_call(
            functools.partial(_ln_ffn_resident_kernel, eps=eps),
            out_shape=jax.ShapeDtypeStruct((M, E), x.dtype),
            grid=(n_rows,),
            in_specs=[
                pl.BlockSpec((tm, E), lambda i: (i, 0)),
                _inv_spec((1, E), lambda i: (0, 0)),      # gamma
                _inv_spec((1, E), lambda i: (0, 0)),      # beta
                _inv_spec((E, Dff), lambda i: (0, 0)),    # w1 (resident)
                _inv_spec((1, Dff), lambda i: (0, 0)),    # b1
                _inv_spec((Dff, E), lambda i: (0, 0)),    # w2 (resident)
                _inv_spec((1, E), lambda i: (0, 0)),      # b2
            ],
            out_specs=pl.BlockSpec((tm, E), lambda i: (i, 0)),
            compiler_params=pltpu.CompilerParams(
                dimension_semantics=("parallel",),
                vmem_limit_bytes=vmem),
        )(*args)
        return out.reshape(B, S, E)

    # ---- large d_ff: reduction over divisor-guarded d_ff chunks --------------
    tff = _largest_divisor_tile(Dff, block_ff, 128)
    vmem = _vmem_limit_bytes([
        ((tm, E), x.dtype, 2), ((tm, E), x.dtype, 2),
        ((E, tff), wdt, 2), ((tff, E), wdt, 2), ((1, tff), jnp.float32, 2),
        ((1, E), jnp.float32, 3),
        ((tm, E), wdt, 1), ((tm, E), jnp.float32, 1),    # LN cache + f32 accumulator
        ((tm, tff), jnp.float32, 1),                     # h intermediate
    ])
    out = pl.pallas_call(
        functools.partial(_ln_ffn_reduce_kernel, eps=eps),
        out_shape=jax.ShapeDtypeStruct((M, E), x.dtype),
        grid=(n_rows, Dff // tff),
        in_specs=[
            pl.BlockSpec((tm, E), lambda i, j: (i, 0)),
            _inv_spec((1, E), lambda i, j: (0, 0)),       # gamma
            _inv_spec((1, E), lambda i, j: (0, 0)),       # beta
            pl.BlockSpec((E, tff), lambda i, j: (0, j)),  # w1 chunk
            pl.BlockSpec((1, tff), lambda i, j: (0, j)),  # b1 chunk
            pl.BlockSpec((tff, E), lambda i, j: (j, 0)),  # w2 chunk
            _inv_spec((1, E), lambda i, j: (0, 0)),       # b2
        ],
        out_specs=pl.BlockSpec((tm, E), lambda i, j: (i, 0)),
        scratch_shapes=[
            pltpu.VMEM((tm, E), wdt),          # LN(x) cache in weight dtype
            pltpu.VMEM((tm, E), jnp.float32),  # f32 accumulator (seeded with x)
        ],
        compiler_params=pltpu.CompilerParams(
            dimension_semantics=("parallel", "arbitrary"),
            vmem_limit_bytes=vmem),
    )(*args)
    return out.reshape(B, S, E)


# --------------------------------------------------------------------------
# Fused kernel 2: attention sublayer
#   y = x + Wo . MHA(LN(x), kv', kv', mask),  kv' = LN(kv) if normalize_kv else kv
# grid = (batch, q tiles), both parallel.  Causal masks are synthesized in-kernel
# with iota (no mask DMA); per-head context is accumulated straight through the
# matching Wo row-slice (no lane-misaligned concat).  Results are discarded by
# the reference decoder control flow; kept for module fidelity.
# --------------------------------------------------------------------------
def _attn_sublayer_kernel(x_ref, kv_ref, *args, heads, eps, normalize_kv, causal):
    if causal:
        (g_ref, bt_ref, wq_ref, bq_ref, wk_ref, bk_ref,
         wv_ref, bv_ref, wo_ref, bo_ref, o_ref) = args
        mask_ref = None
    else:
        (mask_ref, g_ref, bt_ref, wq_ref, bq_ref, wk_ref, bk_ref,
         wv_ref, bv_ref, wo_ref, bo_ref, o_ref) = args

    x = x_ref[0].astype(jnp.float32)            # (tq, E)
    kv = kv_ref[0].astype(jnp.float32)          # (Skv, E)
    g = g_ref[...].astype(jnp.float32)
    bt = bt_ref[...].astype(jnp.float32)

    def ln(t):
        n = t.shape[-1]
        mean = jnp.mean(t, axis=-1, keepdims=True)
        var = jnp.sum((t - mean) ** 2, axis=-1, keepdims=True) / (n - 1)
        inv = pl.reciprocal(jnp.sqrt(var) + eps, approx=False)
        return g * (t - mean) * inv + bt

    qin = ln(x)
    kin = ln(kv) if normalize_kv else kv

    tq, E = x.shape
    Skv = kv.shape[0]
    dh = E // heads
    scale = 1.0 / (dh ** 0.5)
    wdt = wq_ref.dtype

    # Projections (pre-scale q once instead of dividing the full score matrix).
    q = (jnp.dot(qin.astype(wdt), wq_ref[...], preferred_element_type=jnp.float32)
         + bq_ref[...].astype(jnp.float32)) * scale
    k = (jnp.dot(kin.astype(wdt), wk_ref[...], preferred_element_type=jnp.float32)
         + bk_ref[...].astype(jnp.float32))
    v = (jnp.dot(kin.astype(wdt), wv_ref[...], preferred_element_type=jnp.float32)
         + bv_ref[...].astype(jnp.float32))

    if causal:
        q0 = pl.program_id(1) * tq
        row = jax.lax.broadcasted_iota(jnp.int32, (tq, Skv), 0) + q0
        col = jax.lax.broadcasted_iota(jnp.int32, (tq, Skv), 1)
        keep = col <= row
    else:
        keep = mask_ref[0, 0] != 0              # (tq, Skv)

    wo = wo_ref[...]                            # (E, E), weight dtype
    out = jnp.zeros((tq, E), jnp.float32)
    for h in range(heads):
        lo = h * dh
        qh = q[:, lo:lo + dh]
        kh = k[:, lo:lo + dh]
        vh = v[:, lo:lo + dh]
        s = jax.lax.dot_general(qh, kh, (((1,), (1,)), ((), ())),
                                preferred_element_type=jnp.float32)   # (tq, Skv)
        s = jnp.where(keep, s, jnp.float32(-1e9))
        s = s - jnp.max(s, axis=-1, keepdims=True)
        p = jnp.exp(s)
        p = p * pl.reciprocal(jnp.sum(p, axis=-1, keepdims=True), approx=True)
        ctx = jnp.dot(p, vh, preferred_element_type=jnp.float32)      # (tq, dh)
        # accumulate straight through this head's Wo row-slice (no concat)
        out = out + jnp.dot(ctx.astype(wdt), wo[lo:lo + dh, :],
                            preferred_element_type=jnp.float32)

    o_ref[0] = (x + out + bo_ref[...].astype(jnp.float32)).astype(o_ref.dtype)


def attention_sublayer(x, kv, ap, gamma, beta, *, heads, normalize_kv,
                       mask=None, causal=False, eps=1e-6, q_block=128):
    """Attention sublayer.  `causal=True` synthesizes the mask in-kernel and
    ignores `mask`; otherwise a dense (B,1,Sq,Skv) mask (nonzero = keep) is used.
    TODO(synk): for very long sequences, stream kv in chunks (flash-style)
    instead of holding the full (Skv, E) block per grid step."""
    assert causal or mask is not None
    B, Sq, E = x.shape
    Skv = kv.shape[1]
    wdt = ap["wq"].dtype
    wb = 1 if _single_buffer_ok() else 2

    tq = _largest_divisor_tile(Sq, min(q_block, Sq), 8)
    n_q = Sq // tq
    grid = (B, n_q)
    const2 = lambda b, qi: (0, 0)

    in_specs = [
        pl.BlockSpec((1, tq, E), lambda b, qi: (b, qi, 0)),
        pl.BlockSpec((1, Skv, E), lambda b, qi: (b, 0, 0)),
    ]
    operands = [x, kv]
    if not causal:
        in_specs.append(pl.BlockSpec((1, 1, tq, Skv), lambda b, qi: (b, 0, qi, 0)))
        operands.append(mask)
    in_specs += [
        _inv_spec((1, E), const2), _inv_spec((1, E), const2),      # gamma, beta
        _inv_spec((E, E), const2), _inv_spec((1, E), const2),      # wq, bq
        _inv_spec((E, E), const2), _inv_spec((1, E), const2),      # wk, bk
        _inv_spec((E, E), const2), _inv_spec((1, E), const2),      # wv, bv
        _inv_spec((E, E), const2), _inv_spec((1, E), const2),      # wo, bo
    ]
    operands += [gamma.reshape(1, E), beta.reshape(1, E),
                 ap["wq"], ap["bq"].reshape(1, E),
                 ap["wk"], ap["bk"].reshape(1, E),
                 ap["wv"], ap["bv"].reshape(1, E),
                 ap["wo"], ap["bo"].reshape(1, E)]

    vmem = _vmem_limit_bytes([
        ((1, tq, E), x.dtype, 2), ((1, Skv, E), kv.dtype, 2),
        ((1, tq, E), x.dtype, 2),                                   # out
        ((1, 1, tq, Skv), jnp.float32, 0 if causal else 2),
        ((E, E), wdt, 4 * wb), ((1, E), jnp.float32, 6 * wb),
        ((tq, E), jnp.float32, 4), ((Skv, E), jnp.float32, 4),      # q/k/v/ln live values
        ((tq, Skv), jnp.float32, 4),                                # score / prob blocks
    ])

    kernel = functools.partial(_attn_sublayer_kernel, heads=heads, eps=eps,
                               normalize_kv=normalize_kv, causal=causal)
    return pl.pallas_call(
        kernel,
        out_shape=jax.ShapeDtypeStruct((B, Sq, E), x.dtype),
        grid=grid,
        in_specs=in_specs,
        out_specs=pl.BlockSpec((1, tq, E), lambda b, qi: (b, qi, 0)),
        compiler_params=pltpu.CompilerParams(
            dimension_semantics=("parallel", "parallel"),
            vmem_limit_bytes=vmem),
    )(*operands)


# --------------------------------------------------------------------------
# decoderLayer forward
# --------------------------------------------------------------------------
def decoder_layer_forward(params, x, memory, align_mask, tgt_mask):
    """Mirror of the PyTorch forward (dropout = identity / eval mode).

    Reference control flow:
        out = norm_1(x); out = self_attn(out,out,out,tgt);  out = x + out
        out = norm_2(x); out = src_attn(out,m,m,align);     out = x + out
        out = norm_3(x); out = feed_forward(out);           out = x + out
    Because norm_2/norm_3 re-normalize `x` (not the running `out`), both
    attention branches are discarded and the returned value is exactly
        x + feed_forward(norm_3(x)),
    which is what the fused kernel below computes (identical semantics,
    without the dead ~2/3 of FLOPs and HBM traffic).
    """
    del memory, align_mask, tgt_mask   # only reach discarded branches
    return fused_ln_ffn_residual(
        x, params["n3_g"], params["n3_b"],
        params["ff_w1"], params["ff_b1"], params["ff_w2"], params["ff_b2"])


# --------------------------------------------------------------------------
# parameter init (matmul weights in bf16 for native-MXU throughput)
# --------------------------------------------------------------------------
def init_params(key, embed_size, d_ff, *, weight_dtype=jnp.bfloat16,
                param_dtype=jnp.float32):
    ks = jax.random.split(key, 10)

    def dense(k, fan_in, fan_out):
        w = (jax.random.normal(k, (fan_in, fan_out), jnp.float32) * 0.02
             ).astype(weight_dtype)
        return w, jnp.zeros((fan_out,), param_dtype)

    def attn_params(ks4):
        wq, bq = dense(ks4[0], embed_size, embed_size)
        wk, bk = dense(ks4[1], embed_size, embed_size)
        wv, bv = dense(ks4[2], embed_size, embed_size)
        wo, bo = dense(ks4[3], embed_size, embed_size)
        return dict(wq=wq, bq=bq, wk=wk, bk=bk, wv=wv, bv=bv, wo=wo, bo=bo)

    ff_w1, ff_b1 = dense(ks[8], embed_size, d_ff)
    ff_w2, ff_b2 = dense(ks[9], d_ff, embed_size)

    ones = jnp.ones((embed_size,), param_dtype)
    zeros = jnp.zeros((embed_size,), param_dtype)
    return dict(
        self_attn=attn_params(ks[0:4]),
        src_attn=attn_params(ks[4:8]),
        ff_w1=ff_w1, ff_b1=ff_b1, ff_w2=ff_w2, ff_b2=ff_b2,
        n1_g=ones, n1_b=zeros, n2_g=ones, n2_b=zeros, n3_g=ones, n3_b=zeros,
    )


# --------------------------------------------------------------------------
# main
# --------------------------------------------------------------------------
if __name__ == "__main__":
    # Lane-dense model dims (E, d_ff multiples of 128) per the perf review;
    # still small enough to run instantly.
    B, S_TGT, S_SRC, E, HEADS, D_FF = 2, 16, 16, 128, 4, 512

    key = jax.random.PRNGKey(0)
    kx, km, kp = jax.random.split(key, 3)

    x = jax.random.normal(kx, (B, S_TGT, E), jnp.float32)
    memory = jax.random.normal(km, (B, S_SRC, E), jnp.float32)

    tgt_mask = jnp.tril(jnp.ones((S_TGT, S_TGT), jnp.float32))
    tgt_mask = jnp.tile(tgt_mask[None, None], (B, 1, 1, 1))        # (B,1,S,S)
    align_mask = jnp.ones((B, 1, S_TGT, S_SRC), jnp.float32)       # (B,1,S,Ssrc)

    params = init_params(kp, E, D_FF, weight_dtype=jnp.bfloat16)

    # ---- decoder layer output (the only path that feeds the result) -------
    fwd = jax.jit(decoder_layer_forward)
    out = fwd(params, x, memory, align_mask, tgt_mask)
    jax.block_until_ready(out)
    assert out.shape == (B, S_TGT, E)
    assert bool(jnp.all(jnp.isfinite(out)))

    # pure-JAX f32 reference for the surviving path: x + ff(norm_3(x))
    def ref_ffn(p, xx, eps=1e-6):
        f = lambda a: a.astype(jnp.float32)
        mean = jnp.mean(xx, -1, keepdims=True)
        var = jnp.sum((xx - mean) ** 2, -1, keepdims=True) / (xx.shape[-1] - 1)
        ln = f(p["n3_g"]) * (xx - mean) / (jnp.sqrt(var) + eps) + f(p["n3_b"])
        h = jnp.maximum(
            jnp.dot(ln, f(p["ff_w1"]),
                    precision=jax.lax.Precision.HIGHEST) + f(p["ff_b1"]), 0.0)
        return xx + jnp.dot(h, f(p["ff_w2"]),
                            precision=jax.lax.Precision.HIGHEST) + f(p["ff_b2"])

    ref = ref_ffn(params, x)
    assert bool(jnp.allclose(out, ref, atol=2e-2, rtol=2e-2))

    # Also exercise the large-d_ff reduction path of the fused FFN kernel.
    out_b = fused_ln_ffn_residual(
        x, params["n3_g"], params["n3_b"], params["ff_w1"], params["ff_b1"],
        params["ff_w2"], params["ff_b2"],
        weight_resident_budget=0, block_ff=256)
    jax.block_until_ready(out_b)
    assert bool(jnp.allclose(out_b, ref, atol=2e-2, rtol=2e-2))

    # ---- attention sublayer kernels (results discarded by the reference
    #      control flow; exercised here for module fidelity) ----------------
    self_fn = jax.jit(functools.partial(attention_sublayer, heads=HEADS,
                                        normalize_kv=True, causal=True,
                                        q_block=8))
    src_fn = jax.jit(functools.partial(attention_sublayer, heads=HEADS,
                                       normalize_kv=False, causal=False))
    sa = self_fn(x, x, params["self_attn"], params["n1_g"], params["n1_b"])
    ca = src_fn(x, memory, params["src_attn"], params["n2_g"], params["n2_b"],
                mask=align_mask)
    jax.block_until_ready((sa, ca))
    assert sa.shape == (B, S_TGT, E) and ca.shape == (B, S_SRC, E)
    assert bool(jnp.all(jnp.isfinite(sa))) and bool(jnp.all(jnp.isfinite(ca)))

    def ref_attn(ap, g, b, xx, kvv, keep, heads, normalize_kv, eps=1e-6):
        f = lambda a: a.astype(jnp.float32)

        def ln(t):
            mean = jnp.mean(t, -1, keepdims=True)
            var = jnp.sum((t - mean) ** 2, -1, keepdims=True) / (t.shape[-1] - 1)
            return f(g) * (t - mean) / (jnp.sqrt(var) + eps) + f(b)

        qin = ln(xx)
        kin = ln(kvv) if normalize_kv else kvv
        E_ = xx.shape[-1]
        dh = E_ // heads
        q = qin @ f(ap["wq"]) + f(ap["bq"])
        k = kin @ f(ap["wk"]) + f(ap["bk"])
        v = kin @ f(ap["wv"]) + f(ap["bv"])
        Bq, Sq_, _ = xx.shape
        Skv_ = kvv.shape[1]
        qh = q.reshape(Bq, Sq_, heads, dh).transpose(0, 2, 1, 3)
        kh = k.reshape(Bq, Skv_, heads, dh).transpose(0, 2, 1, 3)
        vh = v.reshape(Bq, Skv_, heads, dh).transpose(0, 2, 1, 3)
        s = jnp.einsum("bhqd,bhkd->bhqk", qh, kh) / (dh ** 0.5)
        s = jnp.where(keep, s, -1e9)
        p_ = jax.nn.softmax(s, axis=-1)
        ctx = jnp.einsum("bhqk,bhkd->bhqd", p_, vh)
        ctx = ctx.transpose(0, 2, 1, 3).reshape(Bq, Sq_, E_)
        return xx + ctx @ f(ap["wo"]) + f(ap["bo"])

    sa_ref = ref_attn(params["self_attn"], params["n1_g"], params["n1_b"],
                      x, x, tgt_mask != 0, HEADS, True)
    ca_ref = ref_attn(params["src_attn"], params["n2_g"], params["n2_b"],
                      x, memory, align_mask != 0, HEADS, False)
    assert bool(jnp.allclose(sa, sa_ref, atol=5e-2, rtol=5e-2))
    assert bool(jnp.allclose(ca, ca_ref, atol=5e-2, rtol=5e-2))

    print("KERNEL_OK")
</pallas_src>

<mosaic_0001>
module attributes {stable_mosaic.version = 11 : i64} {
  func.func @_ln_ffn_resident_kernel(%arg0: i32, %arg1: memref<16x128xf32, #tpu.memory_space<vmem>>, %arg2: memref<1x128xf32, #tpu.memory_space<vmem>>, %arg3: memref<1x128xf32, #tpu.memory_space<vmem>>, %arg4: memref<128x512xbf16, #tpu.memory_space<vmem>>, %arg5: memref<1x512xf32, #tpu.memory_space<vmem>>, %arg6: memref<512x128xbf16, #tpu.memory_space<vmem>>, %arg7: memref<1x128xf32, #tpu.memory_space<vmem>>, %arg8: memref<16x128xf32, #tpu.memory_space<vmem>>) attributes {dimension_semantics = [#tpu.dimension_semantics<parallel>], iteration_bounds = array<i64: 2>, scalar_prefetch = 0 : i64, scratch_operands = 0 : i64, tpu.core_type = #tpu.core_type<tc>, window_params = [{transform_indices = @transform_0, window_bounds = array<i64: 16, 128>}, {pipeline_mode = #tpu.pipeline_mode<synchronous>, transform_indices = @transform_1, window_bounds = array<i64: 1, 128>}, {pipeline_mode = #tpu.pipeline_mode<synchronous>, transform_indices = @transform_2, window_bounds = array<i64: 1, 128>}, {pipeline_mode = #tpu.pipeline_mode<synchronous>, transform_indices = @transform_3, window_bounds = array<i64: 128, 512>}, {pipeline_mode = #tpu.pipeline_mode<synchronous>, transform_indices = @transform_4, window_bounds = array<i64: 1, 512>}, {pipeline_mode = #tpu.pipeline_mode<synchronous>, transform_indices = @transform_5, window_bounds = array<i64: 512, 128>}, {pipeline_mode = #tpu.pipeline_mode<synchronous>, transform_indices = @transform_6, window_bounds = array<i64: 1, 128>}, {transform_indices = @transform_7, window_bounds = array<i64: 16, 128>}]} {
    %c0 = arith.constant 0 : index
    %c0_0 = arith.constant 0 : index
    %0 = vector.load %arg1[%c0, %c0_0] : memref<16x128xf32, #tpu.memory_space<vmem>>, vector<16x128xf32>
    %cst = arith.constant dense<0.000000e+00> : vector<16xf32>
    %1 = vector.multi_reduction <add>, %0, %cst [1] : vector<16x128xf32> to vector<16xf32>
    %2 = vector.shape_cast %1 : vector<16xf32> to vector<16x1xf32>
    %cst_1 = arith.constant 1.280000e+02 : f32
    %3 = vector.broadcast %cst_1 : f32 to vector<16x1xf32>
    %4 = arith.divf %2, %3 : vector<16x1xf32>
    %5 = vector.broadcast %4 : vector<16x1xf32> to vector<16x128xf32>
    %6 = arith.subf %0, %5 : vector<16x128xf32>
    %7 = arith.mulf %6, %6 : vector<16x128xf32>
    %cst_2 = arith.constant dense<0.000000e+00> : vector<16xf32>
    %8 = vector.multi_reduction <add>, %7, %cst_2 [1] : vector<16x128xf32> to vector<16xf32>
    %9 = vector.shape_cast %8 : vector<16xf32> to vector<16x1xf32>
    %cst_3 = arith.constant 1.270000e+02 : f32
    %10 = vector.broadcast %cst_3 : f32 to vector<16x1xf32>
    %11 = arith.divf %9, %10 : vector<16x1xf32>
    %12 = math.sqrt %11 : vector<16x1xf32>
    %cst_4 = arith.constant 9.99999997E-7 : f32
    %13 = vector.broadcast %cst_4 : f32 to vector<16x1xf32>
    %14 = arith.addf %12, %13 : vector<16x1xf32>
    %15 = tpu.reciprocal %14 : vector<16x1xf32> -> vector<16x1xf32>
    %c0_5 = arith.constant 0 : index
    %c0_6 = arith.constant 0 : index
    %16 = vector.load %arg2[%c0_5, %c0_6] : memref<1x128xf32, #tpu.memory_space<vmem>>, vector<1x128xf32>
    %17 = vector.broadcast %4 : vector<16x1xf32> to vector<16x128xf32>
    %18 = arith.subf %0, %17 : vector<16x128xf32>
    %19 = vector.broadcast %16 : vector<1x128xf32> to vector<16x128xf32>
    %20 = arith.mulf %19, %18 : vector<16x128xf32>
    %21 = vector.broadcast %15 : vector<16x1xf32> to vector<16x128xf32>
    %22 = arith.mulf %20, %21 : vector<16x128xf32>
    %c0_7 = arith.constant 0 : index
    %c0_8 = arith.constant 0 : index
    %23 = vector.load %arg3[%c0_7, %c0_8] : memref<1x128xf32, #tpu.memory_space<vmem>>, vector<1x128xf32>
    %24 = vector.broadcast %23 : vector<1x128xf32> to vector<16x128xf32>
    %25 = arith.addf %22, %24 : vector<16x128xf32>
    %26 = arith.truncf %25 : vector<16x128xf32> to vector<16x128xbf16>
    %c0_9 = arith.constant 0 : index
    %c0_10 = arith.constant 0 : index
    %27 = vector.load %arg4[%c0_9, %c0_10] : memref<128x512xbf16, #tpu.memory_space<vmem>>, vector<128x512xbf16>
    %cst_11 = arith.constant dense<0.000000e+00> : vector<16x512xf32>
    %28 = tpu.matmul %26, %27, %cst_11 {dimension_numbers = #tpu.dot_dimension_numbers<[1], [0], [0], [1], [0, 0, 1, 1], [], []>} : vector<16x128xbf16>, vector<128x512xbf16>, vector<16x512xf32> -> vector<16x512xf32>
    %c0_12 = arith.constant 0 : index
    %c0_13 = arith.constant 0 : index
    %29 = vector.load %arg5[%c0_12, %c0_13] : memref<1x512xf32, #tpu.memory_space<vmem>>, vector<1x512xf32>
    %30 = vector.broadcast %29 : vector<1x512xf32> to vector<16x512xf32>
    %31 = arith.addf %28, %30 : vector<16x512xf32>
    %cst_14 = arith.constant 0.000000e+00 : f32
    %32 = vector.broadcast %cst_14 : f32 to vector<16x512xf32>
    %33 = arith.maximumf %31, %32 : vector<16x512xf32>
    %34 = arith.truncf %33 : vector<16x512xf32> to vector<16x512xbf16>
    %c0_15 = arith.constant 0 : index
    %c0_16 = arith.constant 0 : index
    %35 = vector.load %arg6[%c0_15, %c0_16] : memref<512x128xbf16, #tpu.memory_space<vmem>>, vector<512x128xbf16>
    %cst_17 = arith.constant dense<0.000000e+00> : vector<16x128xf32>
    %36 = tpu.matmul %34, %35, %cst_17 {dimension_numbers = #tpu.dot_dimension_numbers<[1], [0], [0], [1], [0, 0, 1, 1], [], []>} : vector<16x512xbf16>, vector<512x128xbf16>, vector<16x128xf32> -> vector<16x128xf32>
    %c0_18 = arith.constant 0 : index
    %c0_19 = arith.constant 0 : index
    %37 = vector.load %arg7[%c0_18, %c0_19] : memref<1x128xf32, #tpu.memory_space<vmem>>, vector<1x128xf32>
    %38 = vector.broadcast %37 : vector<1x128xf32> to vector<16x128xf32>
    %39 = arith.addf %36, %38 : vector<16x128xf32>
    %40 = arith.addf %0, %39 : vector<16x128xf32>
    %c0_20 = arith.constant 0 : index
    %c0_21 = arith.constant 0 : index
    %41 = vector.load %arg8[%c0_20, %c0_21] : memref<16x128xf32, #tpu.memory_space<vmem>>, vector<16x128xf32>
    tpu.vector_store %arg8[%c0_20, %c0_21], %40 {strides = array<i32>} : memref<16x128xf32, #tpu.memory_space<vmem>>, vector<16x128xf32>,
    return
  }
  func.func @transform_0(%arg0: i32) -> (i32, i32) {
    %c0_i32 = arith.constant 0 : i32
    %c0_i32_0 = arith.constant 0 : i32
    return %arg0, %c0_i32 : i32, i32
  }
  func.func @transform_1(%arg0: i32) -> (i32, i32) {
    %c0_i32 = arith.constant 0 : i32
    %c0_i32_0 = arith.constant 0 : i32
    %c0_i32_1 = arith.constant 0 : i32
    return %c0_i32, %c0_i32_0 : i32, i32
  }
  func.func @transform_2(%arg0: i32) -> (i32, i32) {
    %c0_i32 = arith.constant 0 : i32
    %c0_i32_0 = arith.constant 0 : i32
    %c0_i32_1 = arith.constant 0 : i32
    return %c0_i32, %c0_i32_0 : i32, i32
  }
  func.func @transform_3(%arg0: i32) -> (i32, i32) {
    %c0_i32 = arith.constant 0 : i32
    %c0_i32_0 = arith.constant 0 : i32
    %c0_i32_1 = arith.constant 0 : i32
    return %c0_i32, %c0_i32_0 : i32, i32
  }
  func.func @transform_4(%arg0: i32) -> (i32, i32) {
    %c0_i32 = arith.constant 0 : i32
    %c0_i32_0 = arith.constant 0 : i32
    %c0_i32_1 = arith.constant 0 : i32
    return %c0_i32, %c0_i32_0 : i32, i32
  }
  func.func @transform_5(%arg0: i32) -> (i32, i32) {
    %c0_i32 = arith.constant 0 : i32
    %c0_i32_0 = arith.constant 0 : i32
    %c0_i32_1 = arith.constant 0 : i32
    return %c0_i32, %c0_i32_0 : i32, i32
  }
  func.func @transform_6(%arg0: i32) -> (i32, i32) {
    %c0_i32 = arith.constant 0 : i32
    %c0_i32_0 = arith.constant 0 : i32
    %c0_i32_1 = arith.constant 0 : i32
    return %c0_i32, %c0_i32_0 : i32, i32
  }
  func.func @transform_7(%arg0: i32) -> (i32, i32) {
    %c0_i32 = arith.constant 0 : i32
    %c0_i32_0 = arith.constant 0 : i32
    return %arg0, %c0_i32 : i32, i32
  }
}

</mosaic_0001>

<bundles_post_ra>
// kernel: decoder_layer_forward.1
= control target key start
LH: loop header
LB: loop body
LE: loop exit
PB: predicated region body
PF: predicated region fallthrough
CT: control target
= control target key end

     0   :  { %s1877_s0 = inlined_call_operand.hbm [shape: f32[32,128], index: 0, kind: input, shape index: {}]   ;;  %s1878_s1 = inlined_call_operand.vmem [shape: f32[1,128], index: 1, kind: input, shape index: {}]   ;;  %s1879_s2 = inlined_call_operand.vmem [shape: f32[1,128], index: 2, kind: input, shape index: {}]   ;;  %s1880_s3 = inlined_call_operand.hbm [shape: bf16[128,512], index: 3, kind: input, shape index: {}]   ;;  %s1881_s4 = inlined_call_operand.vmem [shape: f32[1,512], index: 4, kind: input, shape index: {}]   ;;  %s1882_s5 = inlined_call_operand.hbm [shape: bf16[512,128], index: 5, kind: input, shape index: {}]   ;;  %s1883_s6 = inlined_call_operand.vmem [shape: f32[1,128], index: 6, kind: input, shape index: {}]   ;;  %s1884_s7 = inlined_call_operand.hbm [shape: f32[32,128], index: 7, kind: output, shape index: {}]  }
   0x1   :  { %1889 = sst [smem:[#allocation12_spill]] %s1880_s3 }
   0x2   :  { %12 = vsyncpa [#allocation3], 0 }
   0x3   :  { %14 = vsyncpa [#allocation3 + $0x1], 0 }
   0x4   :  { %15 = vsyncpa [#allocation6], 0 }
   0x5   :  { %16 = vsyncpa [#allocation4], 0 }
   0x6   :  { %18 = vsyncpa [#allocation4 + $0x1], 0  ;;  %s1653_s24 = smov 0   ;;  %s1655_s25 = smov 0  }
   0x7   :  { %s1657_s26 = smov 0   ;;  %s1659_s27 = smov 0  }
   0x8 LB: > { %s1674_s28 = sadd.s32 4294967295, %s1598_s27   ;;  %s1155_s29 = sadd.s32 4294967294, %s1598_s27   ;;  %s1598_s27 = sphi %s1659_s27, %s1908_s27   ;;  %s1594_s26 = sphi %s1657_s26, %s1907_s26   ;;  %s1590_s25 = sphi %s1655_s25, %s1906_s25   ;;  %s1586_s24 = sphi %s1653_s24, %s1905_s24  }
   0x9   : > { %p44_p0 = scmp.ne.s32.totalorder %s1590_s25, %s1586_s24  ;;  %p1885_p1 = scmp.eq.s32.totalorder %s1674_s28, 0 }
   0xa   : > { %p200_p3 = scmp.eq.s32.totalorder %s1155_s29, 1  ;;  %p1156_p5 = scmp.ge.s32.totalorder %s1598_s27, 1 }
   0xb   : > { %p1683_p4 = por %p1885_p1, %p44_p0  ;;  %p207_p7 = scmp.lt.s32.totalorder %s1598_s27, 3 }
   0xc   : > { %p1688_p6 = por %p200_p3, %p44_p0  ;;  %s1600_s10 = smov [#allocation5]  }
   0xd   : > { %s1890_s30 = scalar_select %p1683_p4, 1, 0 }
   0xe   : > { %s1891_s8 = scalar_select %p1688_p6, 1, 0 }
   0xf   : > { %p1693_p8 = pnand %p1156_p5, %p207_p7  ;;  %s225_s11 = sshll.u32 %s1600_s10, 4  ;;  %s226_s11 = int_to_ptr.vmem [resolvable:$true] %s225_s11 }
  0x10   : > { %s1601_s13 = smov [#allocation7]   ;;  %s1461_s15 = scalar_lea.vmem %s226_s11, 4096 }
  0x11   : > { %s1892_s9 = scalar_select %p1693_p8, 1, 0 }
  0x12   : > { %p1298_p9 = pneg %p1693_p8  ;;  %s241_s14 = sshll.u32 %s1601_s13, 4  ;;  %s242_s14 = int_to_ptr.vmem [resolvable:$true] %s241_s14 }
  0x13   : > { %p1462_p13 = scmp.ne.s32.totalorder %s226_s11, %s1461_s15  ;;  %p1469_p5 = scmp.lt.s32.totalorder %s226_s11, %s226_s11 }
  0x14   : > { %p1702_p11 = pnand %p1298_p9, %p1885_p1  ;;  %p1470_p7 = scmp.lt.s32.totalorder %s1461_s15, %s1461_s15 }
  0x16   : > { %p1452_p12 = pneg %p1702_p11  ;;  %p1471_p10 = por %p1470_p7, %p1469_p5 }
  0x18   : > { %p1464_p0 = pnand %p1462_p13, %p1452_p12 }
  0x1a   : > { %p1465_p3 = pneg %p1464_p0 }
  0x1c   : > { %p1472_p9 = pnand %p1471_p10, %p1465_p3 }
  0x1e   : > { %1475 = shalt.err (!%p1472_p9)
}
  0x1f   : > { %s1602_s16 = smov 256   ;;  %s1603_s17 = smov 16  }
  0x20   : > { %s1894_s3 = sld [smem:[#allocation12_spill]]  ;;  %s1487_s20 = scalar_lea.vmem %s242_s14, 4096 }
  0x21   : > { %p1488_p1 = scmp.ne.s32.totalorder %s242_s14, %s1487_s20  ;;  %p1495_p2 = scmp.lt.s32.totalorder %s242_s14, %s242_s14 }
  0x22   : > { %p1496_p6 = scmp.lt.s32.totalorder %s1487_s20, %s1487_s20 }
  0x23   : > { %p1490_p13 = pnand %p1488_p1, %p1452_p12 }
  0x24   : > { %p1497_p5 = por %p1496_p6, %p1495_p2 }
  0x25   : > { %p1491_p0 = pneg %p1490_p13 }
  0x26   : > { %1301 = dma.hbm_to_vmem [thread:$0]  (!%p1702_p11), %s1894_s3, 4096, %s226_s11, [#allocation6], %s1602_s16, %s1602_s16, %s1603_s17  }
  0x27   : > { %p1498_p10 = pnand %p1497_p5, %p1491_p0 }
  0x29   : > { %1501 = shalt.err (!%p1498_p10)
}
  0x2a   : > { %s1604_s21 = smov 64   ;;  %s1605_s22 = smov 4  }
  0x2b   : > { %1304 = dma.hbm_to_vmem [thread:$0]  (!%p1702_p11), %s1882_s5, 4096, %s242_s14, [#allocation6], %s1604_s21, %s1604_s21, %s1605_s22  }
  0x2c   : > { %s1725_s10 = sadd.s32 1, %s1598_s27   ;;  %s31_s13 = sadd.s32 1, %s1594_s26 }
  0x2d   : > { %s28_s11 = ssub.s32 %s1598_s27, %s1725_s10  ;;  %p38_p2 = scmp.ne.s32.totalorder %s1594_s26, %s1590_s25 }
  0x2e   : > { %p29_p1 = scmp.eq.s32.totalorder %s28_s11, 0  ;;  %p39_p6 = scmp.eq.s32.totalorder %s1598_s27, 0 }
  0x2f   : > { %p1895_p3 = scmp.eq.s32.totalorder %s1674_s28, 1  ;;  %p1315_p9 = scmp.lt.s32.totalorder %s1598_s27, 2 }
  0x30   : > { %s1734_s15 = scalar_select %p29_p1, %s1594_s26, %s31_s13  }
  0x31   : > { %p40_p12 = por %p39_p6, %p38_p2  ;;  %p1738_p7 = por %p1895_p3, %p38_p2 }
  0x32   : > { %s258_s12 = sand.u32 1, %s1594_s26   ;;  %s1240_s14 = sshll.u32 %s1598_s27, 8 }
  0x33   : > { %s1896_s16 = scalar_select %p1738_p7, 1, 0 }
  0x34   : > { %s1160_s17 = sshll.u32 %s258_s12, 4  ;;  %s1748_s20 = scalar_lea.hbm %s1877_s0, %s1240_s14 }
  0x35   : > { %s262_s21 = scalar_lea.vmem [#allocation2], %s1160_s17  ;;  %p1752_p11 = pnand %p1315_p9, %p40_p12 }
  0x36   : > { %s269_s22 = sshll.u32 %s262_s21, 4  ;;  %s1756_s29 = scalar_lea.sflag [#allocation3], %s258_s12  ;;  %s1750_s22 = int_to_ptr.vmem [resolvable:$true] %s269_s22 }
  0x37   : > { %s1502_s11 = scalar_lea.hbm %s1748_s20, 256  ;;  %p1504_p0 = pneg %p1752_p11 }
  0x38   : > { %p1503_p13 = scmp.ne.s32.totalorder %s1748_s20, %s1502_s11  ;;  %s1507_s17 = scalar_lea.hbm %s1877_s0, 512 }
  0x39   : > { %p1508_p1 = scmp.lt.s32.totalorder %s1748_s20, %s1877_s0  ;;  %p1509_p2 = scmp.lt.s32.totalorder %s1507_s17, %s1502_s11 }
  0x3a   : > { %p1505_p5 = pnand %p1504_p0, %p1503_p13 }
  0x3b   : > { %p1510_p6 = por %p1509_p2, %p1508_p1 }
  0x3c   : > { %p1506_p10 = pneg %p1505_p5 }
  0x3e   : > { %p1511_p12 = pnand %p1510_p6, %p1506_p10 }
  0x40   : > { %1514 = shalt.err (!%p1511_p12)
}
  0x41   : > { %s1515_s12 = scalar_lea.vmem %s1750_s22, 256  ;;  %s1606_s21 = smov [#allocation2]  }
  0x42   : > { %p1516_p3 = scmp.ne.s32.totalorder %s1750_s22, %s1515_s12  ;;  %s1520_s3 = sshll.u32 %s1606_s21, 4  ;;  %s1521_s3 = int_to_ptr.vmem [resolvable:$false] %s1520_s3 }
  0x43   : > { %s1522_s13 = scalar_lea.vmem %s1521_s3, 512  ;;  %p1523_p5 = scmp.lt.s32.totalorder %s1750_s22, %s1521_s3 }
  0x44   : > { %p1518_p9 = pnand %p1516_p3, %p1504_p0  ;;  %p1524_p7 = scmp.lt.s32.totalorder %s1522_s13, %s1515_s12 }
  0x46   : > { %p1519_p13 = pneg %p1518_p9  ;;  %p1525_p4 = por %p1524_p7, %p1523_p5 }
  0x48   : > { %p1526_p8 = pnand %p1525_p4, %p1519_p13 }
  0x4a   : > { %1529 = shalt.err (!%p1526_p8)
}
  0x4b   : > { %s1607_s11 = smov 128   ;;  %s1608_s14 = smov 8  }
  0x4c   : > { %1308 = dma.hbm_to_vmem [thread:$0]  (!%p1752_p11), %s1748_s20, 256, %s1750_s22, %s1756_s29, %s1607_s11, %s1607_s11, %s1608_s14  }
  0x4d   : > { %p1898_p0 = scmp.ne.s32.totalorder %s1892_s9, 0 }
  0x4e   : > { %s1780_s17 = sand.u32 (!%p1898_p0), 1, %s1590_s25   ;;  %p1899_p4 = scmp.ne.s32.totalorder (!%p1898_p0), %s1890_s30, 0 }
  0x4f   : > { %281 = sbr.rel (%p1898_p0) target bundleno = 844 (0x34c), region = 48  ;;  %s1164_s3 = sshll.u32 (!%p1898_p0), %s1780_s17, 4 }
  0x50   : > { %s284_s18 = scalar_lea.sflag (!%p1898_p0), [#allocation3], %s1780_s17  ;;  %s287_s19 = scalar_lea.vmem (!%p1898_p0), [#allocation2], %s1164_s3 }
  0x54   : > { %1573 = dma.done.wait (%p1899_p4), %s284_s18, 256  }
  0x55   : > { %1575 = vsyncadd (%p1899_p4), %s284_s18, 4294967040  ;;  %p1900_p8 = scmp.eq.s32.totalorder %s1674_s28, 0 }
  0x57   : > { %1577 = dma.done.wait (%p1900_p8), [#allocation6], 8192   ;;  %p1901_p7 = pmov %p1900_p8 }
  0x58   : > { %v1794_v0 = vld [vmem:[%s287_s19] sm:$0xff]  ;;  %v1796_v1 = vld [vmem:[%s287_s19 + $0x8] sm:$0xff]  ;;  %v1609_v36 = vmov 0   ;;  %s325_s13 = scalar_lea.vmem [#allocation8], %s1164_s3  ;;  %s1241_s14 = sshll.u32 %s1674_s28, 8 }
  0x59   : > { %1579 = vsyncadd (%p1901_p7), [#allocation6], 4294959104  ;;  %331 = vadd.xlane.f32.xlu0 %v1794_v0  ;;  %v1362_v10 = vld [vmem:[#allocation5 + $0xe4] ss:$16 sps:$4 sm:$0xff]   ;;  %v1364_v11 = vld [vmem:[#allocation5 + $0xec] ss:$16 sps:$4 sm:$0xff]   ;;  %634 = vmatprep.mubr.bf16.mxu0 %v1609_v36  ;;  %s1833_s30 = scalar_lea.hbm %s1884_s7, %s1241_s14 }
  0x5a   : > { %v1366_v12 = vld [vmem:[#allocation5 + $0xe0] ss:$16 sps:$4 sm:$0xff]   ;;  %v1367_v13 = vld [vmem:[#allocation5 + $0xe8] ss:$16 sps:$4 sm:$0xff]   ;;  %602 = vmatprep.subr.bf16.mxu0 %v1362_v10  ;;  %645 = vmatprep.subr.bf16.mxu1 %v1364_v11  ;;  %v1368_v14 = vld [vmem:[#allocation5 + $0xc4] ss:$16 sps:$4 sm:$0xff]  }
  0x5b   : > { %603 = vmatpush1.bf16.msra.mxu0 %v1366_v12  ;;  %646 = vmatpush1.bf16.msra.mxu1 %v1367_v13  ;;  %v1370_v15 = vld [vmem:[#allocation5 + $0xcc] ss:$16 sps:$4 sm:$0xff]   ;;  %v1372_v16 = vld [vmem:[#allocation5 + $0xc0] ss:$16 sps:$4 sm:$0xff]   ;;  %v1373_v17 = vld [vmem:[#allocation5 + $0xc8] ss:$16 sps:$4 sm:$0xff]  }
  0x5c   : > { %604 = vmatprep.subr.bf16.mxu0 %v1368_v14  ;;  %647 = vmatprep.subr.bf16.mxu1 %v1370_v15  ;;  %v1374_v18 = vld [vmem:[#allocation5 + $0xa4] ss:$16 sps:$4 sm:$0xff]   ;;  %v1376_v19 = vld [vmem:[#allocation5 + $0xac] ss:$16 sps:$4 sm:$0xff]   ;;  %v1378_v20 = vld [vmem:[#allocation5 + $0xa0] ss:$16 sps:$4 sm:$0xff]  }
  0x5d   : > { %333 = vadd.xlane.f32.xlu0 %v1796_v1  ;;  %v1379_v21 = vld [vmem:[#allocation5 + $0xa8] ss:$16 sps:$4 sm:$0xff]   ;;  %v1380_v22 = vld [vmem:[#allocation5 + $0x84] ss:$16 sps:$4 sm:$0xff]   ;;  %v1382_v23 = vld [vmem:[#allocation5 + $0x8c] ss:$16 sps:$4 sm:$0xff]   ;;  %677 = vmatprep.mubr.bf16.mxu1 %v1609_v36 }
  0x5e   : > { %v1384_v24 = vld [vmem:[#allocation5 + $0x80] ss:$16 sps:$4 sm:$0xff]   ;;  %v1385_v25 = vld [vmem:[#allocation5 + $0x88] ss:$16 sps:$4 sm:$0xff]   ;;  %v1386_v26 = vld [vmem:[#allocation5 + $0x64] ss:$16 sps:$4 sm:$0xff]  }
  0x5f   : > { %605 = vmatpush1.bf16.msra.mxu0 %v1372_v16  ;;  %648 = vmatpush1.bf16.msra.mxu1 %v1373_v17  ;;  %v1388_v27 = vld [vmem:[#allocation5 + $0x6c] ss:$16 sps:$4 sm:$0xff]   ;;  %v1390_v28 = vld [vmem:[#allocation5 + $0x60] ss:$16 sps:$4 sm:$0xff]   ;;  %v1391_v29 = vld [vmem:[#allocation5 + $0x68] ss:$16 sps:$4 sm:$0xff]  }
  0x60   : > { %606 = vmatprep.subr.bf16.mxu0 %v1374_v18  ;;  %649 = vmatprep.subr.bf16.mxu1 %v1376_v19  ;;  %v1392_v30 = vld [vmem:[#allocation5 + $0x44] ss:$16 sps:$4 sm:$0xff]   ;;  %v1394_v31 = vld [vmem:[#allocation5 + $0x4c] ss:$16 sps:$4 sm:$0xff]   ;;  %v1396_v32 = vld [vmem:[#allocation5 + $0x40] ss:$16 sps:$4 sm:$0xff]  }
  0x61   : > { %v1397_v33 = vld [vmem:[#allocation5 + $0x48] ss:$16 sps:$4 sm:$0xff]   ;;  %v1398_v34 = vld [vmem:[#allocation5 + $0x24] ss:$16 sps:$4 sm:$0xff]   ;;  %v1400_v35 = vld [vmem:[#allocation5 + $0x2c] ss:$16 sps:$4 sm:$0xff]  }
  0x62   : > { %v1402_v37 = vld [vmem:[#allocation5 + $0x20] ss:$16 sps:$4 sm:$0xff]   ;;  %v1403_v38 = vld [vmem:[#allocation5 + $0x28] ss:$16 sps:$4 sm:$0xff]   ;;  %v1404_v39 = vld [vmem:[#allocation5 + $0x4] ss:$16 sps:$4 sm:$0xff]  }
  0x63   : > { %607 = vmatpush1.bf16.msra.mxu0 %v1378_v20  ;;  %650 = vmatpush1.bf16.msra.mxu1 %v1379_v21  ;;  %v1406_v40 = vld [vmem:[#allocation5 + $0xc] ss:$16 sps:$4 sm:$0xff]   ;;  %v1408_v41 = vld [vmem:[#allocation5] ss:$16 sps:$4 sm:$0xff]   ;;  %v1409_v42 = vld [vmem:[#allocation5 + $0x8] ss:$16 sps:$4 sm:$0xff]  }
  0x64   : > { %608 = vmatprep.subr.bf16.mxu0 %v1380_v22  ;;  %651 = vmatprep.subr.bf16.mxu1 %v1382_v23  ;;  %v1410_v43 = vld [vmem:[#allocation7 + $0x78] sm:$0xff]   ;;  %v1168_v61 = vld [vmem:[%s1878_s1] ss:$0 sm:$0xff]  ;;  %v1414_v14 = vld [vmem:[#allocation7 + $0x70] sm:$0xff]   ;;  %s1063_s11 = sshll.u32 %s325_s13, 4  ;;  %s1050_s3 = scalar_lea.sflag [#allocation4], %s1780_s17  ;;  %s1828_s11 = int_to_ptr.vmem [resolvable:$true] %s1063_s11 }
  0x65   : > { %v1411_v44 = vld [vmem:[#allocation7 + $0xf8] sm:$0xff]   ;;  %v1415_v15 = vld [vmem:[#allocation7 + $0xf0] sm:$0xff]   ;;  %v1418_v16 = vld [vmem:[#allocation7 + $0x68] sm:$0xff]   ;;  %s1530_s9 = scalar_lea.vmem %s1828_s11, 256  ;;  %p1902_p10 = scmp.ne.s32.totalorder %s1896_s16, 0 }
  0x66   : > { %v1412_v11 = vld [vmem:[#allocation7 + $0x38] sm:$0xff]   ;;  %v1419_v17 = vld [vmem:[#allocation7 + $0xe8] sm:$0xff]   ;;  %v1422_v20 = vld [vmem:[#allocation7 + $0x60] sm:$0xff]   ;;  %p1531_p11 = scmp.ne.s32.totalorder %s1828_s11, %s1530_s9  ;;  %s1610_s28 = smov [#allocation8]  }
  0x67   : > { %609 = vmatpush1.bf16.msra.mxu0 %v1384_v24  ;;  %652 = vmatpush1.bf16.msra.mxu1 %v1385_v25  ;;  %v1413_v12 = vld [vmem:[#allocation7 + $0xb8] sm:$0xff]   ;;  %v1420_v18 = vld [vmem:[#allocation7 + $0x28] sm:$0xff]   ;;  %v1423_v21 = vld [vmem:[#allocation7 + $0xe0] sm:$0xff]   ;;  %s1534_s20 = sshll.u32 %s1610_s28, 4  ;;  %s1535_s20 = int_to_ptr.vmem [resolvable:$false] %s1534_s20 }
  0x68   : > { %610 = vmatprep.subr.bf16.mxu0 %v1386_v26  ;;  %653 = vmatprep.subr.bf16.mxu1 %v1388_v27  ;;  %v1421_v19 = vld [vmem:[#allocation7 + $0xa8] sm:$0xff]   ;;  %v1424_v22 = vld [vmem:[#allocation7 + $0x20] sm:$0xff]   ;;  %v1426_v24 = vld [vmem:[#allocation7 + $0x58] sm:$0xff]   ;;  %p1532_p1 = pnand %p1531_p11, %p1902_p10  ;;  %s1536_s22 = scalar_lea.vmem %s1535_s20, 512 }
  0x69   : > { %v1425_v23 = vld [vmem:[#allocation7 + $0xa0] sm:$0xff]   ;;  %v1427_v25 = vld [vmem:[#allocation7 + $0xd8] sm:$0xff]   ;;  %p1537_p6 = scmp.lt.s32.totalorder %s1828_s11, %s1535_s20  ;;  %p1538_p12 = scmp.lt.s32.totalorder %s1536_s22, %s1530_s9 }
  0x6a   : > { %v1428_v26 = vld [vmem:[#allocation7 + $0x18] sm:$0xff]   ;;  %v1438_v36 = vld [vmem:[#allocation7 + $0x40] sm:$0xff]   ;;  %p1533_p2 = pneg %p1532_p1 }
  0x6b   : > { %611 = vmatpush1.bf16.msra.mxu0 %v1390_v28  ;;  %654 = vmatpush1.bf16.msra.mxu1 %v1391_v29  ;;  %v1429_v27 = vld [vmem:[#allocation7 + $0x98] sm:$0xff]   ;;  %v1430_v28 = vld [vmem:[#allocation7 + $0x50] sm:$0xff]   ;;  %p1539_p3 = por %p1538_p12, %p1537_p6 }
  0x6c   : > { %612 = vmatprep.subr.bf16.mxu0 %v1392_v30  ;;  %655 = vmatprep.subr.bf16.mxu1 %v1394_v31  ;;  %v1431_v29 = vld [vmem:[#allocation7 + $0xd0] sm:$0xff]  }
  0x6d   : > { %v1432_v30 = vld [vmem:[#allocation7 + $0x10] sm:$0xff]   ;;  %p1540_p9 = pnand %p1539_p3, %p1533_p2 }
  0x6e   : > { %v1433_v31 = vld [vmem:[#allocation7 + $0x90] sm:$0xff]  }
  0x6f   : > { %613 = vmatpush1.bf16.msra.mxu0 %v1396_v32  ;;  %656 = vmatpush1.bf16.msra.mxu1 %v1397_v33  ;;  %v1434_v32 = vld [vmem:[#allocation7 + $0x48] sm:$0xff]  }
  0x70   : > { %614 = vmatprep.subr.bf16.mxu0 %v1398_v34  ;;  %657 = vmatprep.subr.bf16.mxu1 %v1400_v35  ;;  %v1435_v33 = vld [vmem:[#allocation7 + $0xc8] sm:$0xff]  }
  0x71   : > { %v1436_v34 = vld [vmem:[#allocation7 + $0x8] sm:$0xff]  }
  0x72   : > { %v1437_v35 = vld [vmem:[#allocation7 + $0x88] sm:$0xff]  }
  0x73   : > { %615 = vmatpush1.bf16.msra.mxu0 %v1402_v37  ;;  %658 = vmatpush1.bf16.msra.mxu1 %v1403_v38  ;;  %v1439_v37 = vld [vmem:[#allocation7 + $0xc0] sm:$0xff]  }
  0x74   : > { %616 = vmatprep.subr.bf16.mxu0 %v1404_v39  ;;  %659 = vmatprep.subr.bf16.mxu1 %v1406_v40  ;;  %v1440_v38 = vld [vmem:[#allocation7] sm:$0xff]   ;;  %v422_v40 = vlaneseq }
  0x75   : > { %v1441_v39 = vld [vmem:[#allocation7 + $0x80] sm:$0xff]  }
  0x77   : > { %617 = vmatpush1.bf16.msra.mxu0 %v1408_v41  ;;  %660 = vmatpush1.bf16.msra.mxu1 %v1409_v42  ;;  %v423_v41 = vshrl.u32 %v422_v40, 7 }
  0x78   : > { %1242 = vmatprep.subr.bf16.mxu0 %v1410_v43  ;;  %1264 = vmatprep.subr.bf16.mxu1 %v1411_v44 }
  0x79   : > { %v428_v42 = vsub.s32 1, %v423_v41  ;;  %v436_v43 = vsub.s32 3, %v423_v41  ;;  %v424_v44 = vsub.s32 0, %v423_v41 }
  0xe2   : > { %v332_v2 = vpop.xlane.xlu0 %331 }
  0xe3   : > { %v336_v3 = vmul.f32 0.0078125, %v332_v2 }
  0xe5   : > { %v1801_v4 = vsub.f32 %v1794_v0, %v336_v3 }
  0xe6   : > { %v334_v5 = vpop.xlane.xlu0 %333 }
  0xe7   : > { %v337_v6 = vmul.f32 0.0078125, %v334_v5  ;;  %v340_v7 = vmul.f32 %v1801_v4, %v1801_v4  ;;  %v374_v63 = vmul.f32 %v1168_v61, %v1801_v4  ;;  %v1416_v4 = vld [vmem:[#allocation7 + $0x30] sm:$0xff]  }
  0xe9   : > { %v1806_v8 = vsub.f32 %v1796_v1, %v337_v6  ;;  %342 = vadd.xlane.f32.xlu1 %v340_v7  ;;  %v1169_v6 = vld [vmem:[%s1879_s2] ss:$0 sm:$0xff] }
  0xeb   : > { %v341_v9 = vmul.f32 %v1806_v8, %v1806_v8  ;;  %v375_v2 = vmul.f32 %v1168_v61, %v1806_v8  ;;  %v1417_v8 = vld [vmem:[#allocation7 + $0xb0] sm:$0xff]  }
  0xed   : > { %344 = vadd.xlane.f32.xlu1 %v341_v9 }
 0x172   : > { %v343_v45 = vpop.xlane.xlu1 %342 }
 0x173   : > { %v347_v46 = vmul.f32 0.007874016, %v343_v45  ;;  %v432_v45 = vsub.s32 2, %v423_v41 }
 0x175   : > { %1442 = vrsqrt.f32 %v347_v46  ;;  %vm351_vm0 = vcmp.eq.f32.partialorder %v347_v46, inf  ;;  %v354_v51 = vand.u32 2147483648, %v347_v46  ;;  %vm353_vm1 = vcmp.eq.f32.partialorder %v347_v46, 0.0 }
 0x176   : > { %v345_v47 = vpop.xlane.xlu1 %344 }
 0x177   : > { %v348_v48 = vmul.f32 0.007874016, %v345_v47 }
 0x179   : > { %1444 = vrsqrt.f32 %v348_v48  ;;  %vm358_vm2 = vcmp.eq.f32.partialorder %v348_v48, inf  ;;  %v361_v57 = vand.u32 2147483648, %v348_v48  ;;  %vm360_vm3 = vcmp.eq.f32.partialorder %v348_v48, 0.0 }
 0x182   : > { %v1443_v49 = vpop.eup %1442 }
 0x183   : > { %v350_v50 = vmul.f32 %v1443_v49, %v347_v46 }
 0x185   : > { %v352_v52 = vsel %vm351_vm0, %v347_v46, %v350_v50  ;;  %v420_v46 = vld [vmem:[%s1881_s4] sm:$0xf] }
 0x186   : > { %v1445_v53 = vpop.eup %1444  ;;  %v355_v54 = vsel %vm353_vm1, %v354_v51, %v352_v52  ;;  %v429_v49 = vrot.slane %v420_v46, %v428_v42  ;;  %v437_v50 = vrot.slane %v420_v46, %v436_v43  ;;  %v425_v51 = vrot.slane %v420_v46, %v424_v44 }
 0x187   : > { %v363_v55 = vadd.f32 1e-06, %v355_v54  ;;  %v357_v56 = vmul.f32 %v1445_v53, %v348_v48  ;;  %v433_v52 = vrot.slane %v420_v46, %v432_v45 }
 0x189   : > { %1446 = vrcp.f32 %v363_v55  ;;  %v359_v58 = vsel %vm358_vm2, %v348_v48, %v357_v56 }
 0x18a   : > { %v362_v59 = vsel %vm360_vm3, %v361_v57, %v359_v58 }
 0x18b   : > { %v364_v60 = vadd.f32 1e-06, %v362_v59 }
 0x18d   : > { %1448 = vrcp.f32 %v364_v60 }
 0x196   : > { %v1447_v62 = vpop.eup %1446 }
 0x197   : > { %v376_v3 = vmul.f32 %v1447_v62, %v374_v63 }
 0x199   : > { %v385_v9 = vadd.f32 %v1169_v6, %v376_v3 }
 0x19a   : > { %v1449_v5 = vpop.eup %1448 }
 0x19b   : > { %v377_v7 = vmul.f32 %v1449_v5, %v375_v2 }
 0x19d   : > { %v386_v10 = vadd.f32 %v1169_v6, %v377_v7 }
 0x19f   : > { %v387_v13 = vpack.c.bf16 %v386_v10, %v385_v9 }
 0x1a1   : > { %635 = vmatmul.mubr.bf16.vlgmr.msra.gmra.mxu0 %v387_v13  ;;  %678 = vmatmul.mubr.bf16.vlgmr.msra.gmra.mxu1 %v387_v13 }
 0x1a2   : > { %1243 = vmatpush3.bf16.msra.mxu0 %v1412_v11  ;;  %1265 = vmatpush3.bf16.msra.mxu1 %v1413_v12 }
 0x1a3   : > { %1244 = vmatprep.subr.bf16.mxu0 %v1414_v14  ;;  %1266 = vmatprep.subr.bf16.mxu1 %v1415_v15 }
 0x1a6   : > { %1245 = vmatpush3.bf16.msra.mxu0 %v1416_v4  ;;  %1267 = vmatpush3.bf16.msra.mxu1 %v1417_v8 }
 0x1a7   : > { %1246 = vmatprep.subr.bf16.mxu0 %v1418_v16  ;;  %1268 = vmatprep.subr.bf16.mxu1 %v1419_v17 }
 0x1aa   : > { %1247 = vmatpush3.bf16.msra.mxu0 %v1420_v18  ;;  %1269 = vmatpush3.bf16.msra.mxu1 %v1421_v19  ;;  %v1202_v19 = vld [vmem:[%s1883_s6] ss:$0 sm:$0xff] }
 0x1ab   : > { %1248 = vmatprep.subr.bf16.mxu0 %v1422_v20  ;;  %1270 = vmatprep.subr.bf16.mxu1 %v1423_v21 }
 0x1ae   : > { %1249 = vmatpush3.bf16.msra.mxu0 %v1424_v22  ;;  %1271 = vmatpush3.bf16.msra.mxu1 %v1425_v23 }
 0x1af   : > { %1250 = vmatprep.subr.bf16.mxu0 %v1426_v24  ;;  %1272 = vmatprep.subr.bf16.mxu1 %v1427_v25 }
 0x1b2   : > { %1251 = vmatpush3.bf16.msra.mxu0 %v1428_v26  ;;  %1273 = vmatpush3.bf16.msra.mxu1 %v1429_v27 }
 0x1b3   : > { %1252 = vmatprep.subr.bf16.mxu0 %v1430_v28  ;;  %1274 = vmatprep.subr.bf16.mxu1 %v1431_v29 }
 0x1b6   : > { %1253 = vmatpush3.bf16.msra.mxu0 %v1432_v30  ;;  %1275 = vmatpush3.bf16.msra.mxu1 %v1433_v31 }
 0x1b7   : > { %1254 = vmatprep.subr.bf16.mxu0 %v1434_v32  ;;  %1276 = vmatprep.subr.bf16.mxu1 %v1435_v33 }
 0x1ba   : > { %1255 = vmatpush3.bf16.msra.mxu0 %v1436_v34  ;;  %1277 = vmatpush3.bf16.msra.mxu1 %v1437_v35 }
 0x1bb   : > { %1256 = vmatprep.subr.bf16.mxu0 %v1438_v36  ;;  %1278 = vmatprep.subr.bf16.mxu1 %v1439_v37 }
 0x1be   : > { %1257 = vmatpush3.bf16.msra.mxu0 %v1440_v38  ;;  %1279 = vmatpush3.bf16.msra.mxu1 %v1441_v39 }
 0x261   : > { %v636_v47 = vpop.f32.mrf.mxu0  ;;  %v679_v48 = vpop.f32.mrf.mxu1 }
 0x262   : > { %v637_v61 = vadd.f32 %v636_v47, %v425_v51  ;;  %v680_v62 = vadd.f32 %v679_v48, %v433_v52 }
 0x263   : > { %v638_v53 = vpop.f32.mrf.mxu0  ;;  %v681_v54 = vpop.f32.mrf.mxu1 }
 0x264   : > { %v639_v57 = vadd.f32 %v638_v53, %v429_v49  ;;  %v682_v58 = vadd.f32 %v681_v54, %v437_v50  ;;  %v688_v13 = vmax.f32 %v637_v61, 0.0  ;;  %v690_v14 = vmax.f32 %v680_v62, 0.0 }
 0x265   : > { %v640_v55 = vpop.f32.mrf.mxu0  ;;  %v683_v56 = vpop.f32.mrf.mxu1 }
 0x266   : > { %v641_v59 = vadd.f32 %v640_v55, %v425_v51  ;;  %v684_v60 = vadd.f32 %v683_v56, %v433_v52  ;;  %v689_v9 = vmax.f32 %v639_v57, 0.0  ;;  %v691_v10 = vmax.f32 %v682_v58, 0.0 }
 0x267   : > { %v642_v63 = vpop.f32.mrf.mxu0  ;;  %v685_v2 = vpop.f32.mrf.mxu1 }
 0x268   : > { %v643_v3 = vadd.f32 %v642_v63, %v429_v49  ;;  %v686_v5 = vadd.f32 %v685_v2, %v437_v50  ;;  %v692_v6 = vmax.f32 %v641_v59, 0.0  ;;  %v694_v7 = vmax.f32 %v684_v60, 0.0 }
 0x26a   : > { %v693_v11 = vmax.f32 %v643_v3, 0.0  ;;  %v695_v12 = vmax.f32 %v686_v5, 0.0  ;;  %v696_v8 = vpack.c.bf16 %v692_v6, %v688_v13  ;;  %v698_v16 = vpack.c.bf16 %v694_v7, %v690_v14 }
 0x26c   : > { %v697_v15 = vpack.c.bf16 %v693_v11, %v689_v9  ;;  %v699_v4 = vpack.c.bf16 %v695_v12, %v691_v10 }
 0x26e   : > { %995 = vmatprep.mubr.bf16.mxu0 %v697_v15  ;;  %1036 = vmatprep.mubr.bf16.mxu1 %v699_v4 }
 0x26f   : > { %996 = vmatmul.mubr.bf16.vlgmr.msra.gmra.mxu0 %v696_v8  ;;  %1037 = vmatmul.mubr.bf16.vlgmr.msra.gmra.mxu1 %v698_v16 }
 0x32f   : > { %v1258_v17 = vpop.f32.mrf.mxu0  ;;  %v1280_v18 = vpop.f32.mrf.mxu1 }
 0x331   : > { %v1259_v20 = vpop.f32.mrf.mxu0  ;;  %v1281_v21 = vpop.f32.mrf.mxu1 }
 0x332   : > { %v1260_v22 = vadd.f32 %v1259_v20, %v1258_v17  ;;  %v1282_v26 = vadd.f32 %v1281_v21, %v1280_v18 }
 0x333   : > { %v1261_v23 = vpop.f32.mrf.mxu0  ;;  %v1283_v24 = vpop.f32.mrf.mxu1 }
 0x334   : > { %v998_v25 = vadd.f32 %v1260_v22, %v1202_v19 }
 0x335   : > { %v1262_v27 = vpop.f32.mrf.mxu0  ;;  %v1284_v28 = vpop.f32.mrf.mxu1 }
 0x336   : > { %v1039_v29 = vadd.f32 %v1282_v26, %v998_v25  ;;  %v1263_v30 = vadd.f32 %v1262_v27, %v1261_v23  ;;  %v1285_v33 = vadd.f32 %v1284_v28, %v1283_v24 }
 0x338   : > { %v1045_v31 = vadd.f32 %v1039_v29, %v1794_v0  ;;  %v1001_v32 = vadd.f32 %v1263_v30, %v1202_v19 }
 0x33a   : > { %1047 = vst [vmem:[%s325_s13] sm:$0xff] %v1045_v31  ;;  %v1042_v34 = vadd.f32 %v1285_v33, %v1001_v32 }
 0x33c   : > { %v1046_v35 = vadd.f32 %v1042_v34, %v1796_v1 }
 0x33e   : > { %1048 = vst [vmem:[%s325_s13 + $0x8] sm:$0xff] %v1046_v35 }
 0x33f   : > { %1543 = shalt.err (!%p1540_p9)
}
 0x340   : > { %s1544_s23 = scalar_lea.hbm %s1833_s30, 256  ;;  %s1548_s21 = scalar_lea.hbm %s1884_s7, 512 }
 0x341   : > { %p1545_p13 = scmp.ne.s32.totalorder %s1833_s30, %s1544_s23  ;;  %p1549_p4 = scmp.lt.s32.totalorder %s1833_s30, %s1884_s7 }
 0x342   : > { %p1550_p8 = scmp.lt.s32.totalorder %s1548_s21, %s1544_s23 }
 0x343   : > { %p1546_p5 = pnand %p1545_p13, %p1902_p10 }
 0x344   : > { %p1551_p7 = por %p1550_p8, %p1549_p4 }
 0x345   : > { %p1547_p0 = pneg %p1546_p5 }
 0x347   : > { %p1552_p11 = pnand %p1551_p7, %p1547_p0 }
 0x349   : > { %1555 = shalt.err (!%p1552_p11)
}
 0x34a   : > { %s1611_s18 = smov 128   ;;  %s1612_s19 = smov 8  }
 0x34b   : > { %1296 = dma.vmem_to_hbm [thread:$0]  (%p1902_p10), %s1828_s11, 256, %s1833_s30, %s1050_s3, %s1611_s18, %s1611_s18, %s1612_s19  }
 0x34c PF: > { %s1078_s9 = sand.u32 1, %s1586_s24   ;;  %p1903_p1 = scmp.ne.s32.totalorder %s1891_s8, 0 }
 0x34d   : > { %p1904_p2 = scmp.ge.s32.totalorder %s1598_s27, 2  ;;  %s1079_s28 = scalar_lea.sflag [#allocation4], %s1078_s9 }
 0x34f   : > { %p1310_p6 = pnand %p1904_p2, %p1903_p1 }
 0x351   : > { %p1311_p12 = pneg %p1310_p6 }
 0x353   : > { %1581 = dma.done.wait (%p1311_p12), %s1079_s28, 256  }
 0x354   : > { %1583 = vsyncadd (%p1311_p12), %s1079_s28, 4294967040  ;;  %p21_p3 = scmp.ge.s32.totalorder %s1725_s10, 4   ;;  %s1905_s24 = smov %s1590_s25 }
 0x355   : > { %s1906_s25 = smov %s1594_s26  ;;  %s1907_s26 = smov %s1734_s15 }
 0x356   : > { %s1908_s27 = smov %s1725_s10  ;;  %23 = sbr.rel (!%p21_p3) target bundleno = 8 (0x8), region = 101 }
 0x35b   :  { %1084 = vsyncpa [#allocation3], 1 }
 0x35c   :  { %1086 = vsyncpa [#allocation3 + $0x1], 1 }
 0x35d   :  { %1087 = vsyncpa [#allocation6], 1 }
 0x35e   :  { %1088 = vsyncpa [#allocation4], 1 }
 0x35f   :  { %1090 = vsyncpa [#allocation4 + $0x1], 1 }

</bundles_post_ra>
